<compile_context>
chip_gen: v6e
topology: v6e:2x2x1
jax: 0.10.0
libtpu: 0.0.40
codegen_flags: <defaults>
</compile_context>

<pallas_src>
import functools

import jax
import jax.numpy as jnp
from jax.experimental import pallas as pl
from jax.experimental.pallas import tpu as pltpu

LANES = 128
SUBLANES = 8
MAX_BLOCK_ROWS = 8192                 # 8192 * 128 * 4 B = 4 MiB per input block
_CHUNK_CANDIDATES = (256, 128, 64, 32, 16, 8)


def _bce_jaccard_partials_kernel(x_ref, t_ref, out_ref, *,
                                 block_rows, chunk_rows):
    """Per-block partial sums: out[0] = [fold(p*t), fold(p+t), fold(bce)]."""
    num_chunks = block_rows // chunk_rows

    def tile_sums(x, t):
        x = x.astype(jnp.float32)
        t = t.astype(jnp.float32)
        # Shared transcendental: e = exp(-|x|) feeds both sigmoid and the
        # numerically stable softplus term of BCE-with-logits.
        e = jnp.exp(-jnp.abs(x))
        pred = jnp.where(x >= 0.0, 1.0, e) / (1.0 + e)        # == sigmoid(x)
        bce = jnp.maximum(x, 0.0) - x * t + jnp.log1p(e)

        def fold(v):
            # (chunk_rows, 128) -> (8, 128): sublane-aligned VPU adds only.
            return jnp.sum(
                v.reshape(chunk_rows // SUBLANES, SUBLANES, LANES), axis=0)

        return fold(pred * t), fold(pred + t), fold(bce)

    if num_chunks == 1:
        s_inter, s_pt, s_bce = tile_sums(x_ref[...], t_ref[...])
    else:
        def body(c, carry):
            si, sp, sb = carry
            r0 = pl.multiple_of(c * chunk_rows, chunk_rows)
            di, dp, db = tile_sums(x_ref[pl.ds(r0, chunk_rows), :],
                                   t_ref[pl.ds(r0, chunk_rows), :])
            return si + di, sp + dp, sb + db

        zero = jnp.zeros((SUBLANES, LANES), jnp.float32)
        s_inter, s_pt, s_bce = jax.lax.fori_loop(
            0, num_chunks, body, (zero, zero, zero), unroll=2)

    out_ref[0, 0, :, :] = s_inter
    out_ref[0, 1, :, :] = s_pt
    out_ref[0, 2, :, :] = s_bce


def _tail_sums(x, t):
    """Plain-JAX partial sums for the ragged tail (same stable math)."""
    x = x.astype(jnp.float32)
    t = t.astype(jnp.float32)
    e = jnp.exp(-jnp.abs(x))
    pred = jnp.where(x >= 0.0, 1.0, e) / (1.0 + e)
    bce = jnp.maximum(x, 0.0) - x * t + jnp.log1p(e)
    return jnp.sum(pred * t), jnp.sum(pred + t), jnp.sum(bce)


def bce_jaccard_loss(logits, target, w_bce=0.5, w_jaccard=0.5):
    """JAX/Pallas equivalent of BCEJaccardLoss().forward(logits, target)."""
    assert logits.shape == target.shape
    n = logits.size

    x_flat = logits.reshape(-1)
    t_flat = target.reshape(-1)

    rows = n // LANES
    rows_aligned = (rows // SUBLANES) * SUBLANES   # vreg-aligned prefix rows

    inter = jnp.float32(0.0)
    pt_sum = jnp.float32(0.0)
    bce_sum = jnp.float32(0.0)
    covered = 0

    if rows_aligned > 0:
        block_rows = min(MAX_BLOCK_ROWS, rows_aligned)
        num_blocks = rows_aligned // block_rows
        covered = num_blocks * block_rows * LANES
        chunk_rows = next(c for c in _CHUNK_CANDIDATES if block_rows % c == 0)

        if n % LANES == 0:
            # Zero-copy reshape; the grid simply does not cover any ragged
            # trailing rows, so no pad / copy / mask on the hot path.
            x2d = x_flat.reshape(rows, LANES)
            t2d = t_flat.reshape(rows, LANES)
        else:
            # TODO(synk): rare non-lane-aligned case pays one prefix-copy pass.
            x2d = x_flat[: rows * LANES].reshape(rows, LANES)
            t2d = t_flat[: rows * LANES].reshape(rows, LANES)

        kernel = functools.partial(
            _bce_jaccard_partials_kernel,
            block_rows=int(block_rows),
            chunk_rows=int(chunk_rows),
        )

        partials = pl.pallas_call(
            kernel,
            out_shape=jax.ShapeDtypeStruct(
                (num_blocks, 3, SUBLANES, LANES), jnp.float32),
            grid_spec=pltpu.PrefetchScalarGridSpec(
                num_scalar_prefetch=0,
                grid=(num_blocks,),
                in_specs=[
                    pl.BlockSpec((block_rows, LANES), lambda i: (i, 0)),
                    pl.BlockSpec((block_rows, LANES), lambda i: (i, 0)),
                ],
                out_specs=pl.BlockSpec((1, 3, SUBLANES, LANES),
                                       lambda i: (i, 0, 0, 0)),
            ),
            compiler_params=pltpu.CompilerParams(
                dimension_semantics=("parallel",),
                vmem_limit_bytes=32 * 1024 * 1024,
            ),
        )(x2d, t2d)
        # TODO(synk): sweep pipeline_mode=pl.Buffered(3) on the input specs for
        # v7x once block size is finalized (cheap, neutral elsewhere).

        sums = jnp.sum(partials, axis=(0, 2, 3))   # tiny (3,) JAX reduce
        inter, pt_sum, bce_sum = sums[0], sums[1], sums[2]

    if covered < n:
        # Ragged tail (< one block): a few lines of plain JAX, no extra HBM
        # pass over the bulk of the data.
        ti, tp, tb = _tail_sums(x_flat[covered:], t_flat[covered:])
        inter = inter + ti
        pt_sum = pt_sum + tp
        bce_sum = bce_sum + tb

    union = pt_sum - inter                 # = P + T - inter
    jaccard = 1.0 - inter / (union + 1e-9)
    bce_mean = bce_sum / jnp.float32(n)
    return w_bce * bce_mean + w_jaccard * jaccard


def bce_jaccard_loss_ref(logits, target, w_bce=0.5, w_jaccard=0.5):
    x = logits.astype(jnp.float32)
    t = target.astype(jnp.float32)
    pred = jax.nn.sigmoid(x)
    inter = jnp.sum(pred * t)
    union = 0.5 * (jnp.sum(pred * (1.0 - t)) + jnp.sum(t * (1.0 - pred))
                   + jnp.sum(t + pred))
    jaccard = 1.0 - inter / (union + 1e-9)
    bce = jnp.mean(jnp.maximum(x, 0.0) - x * t
                   + jnp.log1p(jnp.exp(-jnp.abs(x))))
    return w_bce * bce + w_jaccard * jaccard


if __name__ == "__main__":
    key = jax.random.PRNGKey(0)
    k1, k2 = jax.random.split(key)
    # NCHW, matching the PyTorch convention: (batch=2, channels=4, 16, 16)
    logits = jax.random.normal(k1, (2, 4, 16, 16), dtype=jnp.float32)
    target = (jax.random.uniform(k2, (2, 4, 16, 16)) > 0.5).astype(jnp.float32)

    loss = jax.block_until_ready(bce_jaccard_loss(logits, target))
    ref = jax.block_until_ready(bce_jaccard_loss_ref(logits, target))

    assert jnp.allclose(loss, ref, rtol=1e-5, atol=1e-5), (loss, ref)
    print("KERNEL_OK")
</pallas_src>

<mosaic_0001>
module attributes {stable_mosaic.version = 11 : i64} {
  func.func @_bce_jaccard_partials_kernel(%arg0: i32, %arg1: memref<16x128xf32, #tpu.memory_space<vmem>>, %arg2: memref<16x128xf32, #tpu.memory_space<vmem>>, %arg3: memref<1x3x8x128xf32, #tpu.memory_space<vmem>>) attributes {dimension_semantics = [#tpu.dimension_semantics<parallel>], iteration_bounds = array<i64: 1>, scalar_prefetch = 0 : i64, scratch_operands = 0 : i64, tpu.core_type = #tpu.core_type<tc>, window_params = [{transform_indices = @transform_0, window_bounds = array<i64: 16, 128>}, {transform_indices = @transform_1, window_bounds = array<i64: 16, 128>}, {transform_indices = @transform_2, window_bounds = array<i64: 1, 3, 8, 128>}]} {
    %c0 = arith.constant 0 : index
    %c0_0 = arith.constant 0 : index
    %0 = vector.load %arg1[%c0, %c0_0] : memref<16x128xf32, #tpu.memory_space<vmem>>, vector<16x128xf32>
    %c0_1 = arith.constant 0 : index
    %c0_2 = arith.constant 0 : index
    %1 = vector.load %arg2[%c0_1, %c0_2] : memref<16x128xf32, #tpu.memory_space<vmem>>, vector<16x128xf32>
    %2 = math.absf %0 : vector<16x128xf32>
    %cst = arith.constant 0.000000e+00 : f32
    %3 = vector.broadcast %cst : f32 to vector<16x128xf32>
    %4 = arith.subf %3, %2 : vector<16x128xf32>
    %5 = math.exp %4 : vector<16x128xf32>
    %cst_3 = arith.constant 0.000000e+00 : f32
    %6 = vector.broadcast %cst_3 : f32 to vector<16x128xf32>
    %7 = arith.cmpf oge, %0, %6 : vector<16x128xf32>
    %cst_4 = arith.constant 1.000000e+00 : f32
    %8 = vector.broadcast %cst_4 : f32 to vector<16x128xf32>
    %9 = arith.select %7, %8, %5 : vector<16x128xi1>, vector<16x128xf32>
    %cst_5 = arith.constant 1.000000e+00 : f32
    %10 = vector.broadcast %cst_5 : f32 to vector<16x128xf32>
    %11 = arith.addf %10, %5 : vector<16x128xf32>
    %12 = arith.divf %9, %11 : vector<16x128xf32>
    %cst_6 = arith.constant 0.000000e+00 : f32
    %13 = vector.broadcast %cst_6 : f32 to vector<16x128xf32>
    %14 = arith.maximumf %0, %13 : vector<16x128xf32>
    %15 = arith.mulf %0, %1 : vector<16x128xf32>
    %16 = arith.subf %14, %15 : vector<16x128xf32>
    %17 = math.log1p %5 : vector<16x128xf32>
    %18 = arith.addf %16, %17 : vector<16x128xf32>
    %19 = arith.mulf %12, %1 : vector<16x128xf32>
    %20 = vector.shape_cast %19 : vector<16x128xf32> to vector<2x8x128xf32>
    %cst_7 = arith.constant dense<0.000000e+00> : vector<8x128xf32>
    %21 = vector.multi_reduction <add>, %20, %cst_7 [0] : vector<2x8x128xf32> to vector<8x128xf32>
    %22 = arith.addf %12, %1 : vector<16x128xf32>
    %23 = vector.shape_cast %22 : vector<16x128xf32> to vector<2x8x128xf32>
    %cst_8 = arith.constant dense<0.000000e+00> : vector<8x128xf32>
    %24 = vector.multi_reduction <add>, %23, %cst_8 [0] : vector<2x8x128xf32> to vector<8x128xf32>
    %25 = vector.shape_cast %18 : vector<16x128xf32> to vector<2x8x128xf32>
    %cst_9 = arith.constant dense<0.000000e+00> : vector<8x128xf32>
    %26 = vector.multi_reduction <add>, %25, %cst_9 [0] : vector<2x8x128xf32> to vector<8x128xf32>
    %c0_10 = arith.constant 0 : index
    %c0_11 = arith.constant 0 : index
    %c0_12 = arith.constant 0 : index
    %c0_13 = arith.constant 0 : index
    %27 = vector.load %arg3[%c0_10, %c0_11, %c0_12, %c0_13] : memref<1x3x8x128xf32, #tpu.memory_space<vmem>>, vector<1x1x8x128xf32>
    %28 = vector.shape_cast %27 : vector<1x1x8x128xf32> to vector<8x128xf32>
    %29 = vector.shape_cast %21 : vector<8x128xf32> to vector<1x1x8x128xf32>
    tpu.vector_store %arg3[%c0_10, %c0_11, %c0_12, %c0_13], %29 {strides = array<i32>} : memref<1x3x8x128xf32, #tpu.memory_space<vmem>>, vector<1x1x8x128xf32>,
    %c0_14 = arith.constant 0 : index
    %c1 = arith.constant 1 : index
    %c0_15 = arith.constant 0 : index
    %c0_16 = arith.constant 0 : index
    %30 = vector.load %arg3[%c0_14, %c1, %c0_15, %c0_16] : memref<1x3x8x128xf32, #tpu.memory_space<vmem>>, vector<1x1x8x128xf32>
    %31 = vector.shape_cast %30 : vector<1x1x8x128xf32> to vector<8x128xf32>
    %32 = vector.shape_cast %24 : vector<8x128xf32> to vector<1x1x8x128xf32>
    tpu.vector_store %arg3[%c0_14, %c1, %c0_15, %c0_16], %32 {strides = array<i32>} : memref<1x3x8x128xf32, #tpu.memory_space<vmem>>, vector<1x1x8x128xf32>,
    %c0_17 = arith.constant 0 : index
    %c2 = arith.constant 2 : index
    %c0_18 = arith.constant 0 : index
    %c0_19 = arith.constant 0 : index
    %33 = vector.load %arg3[%c0_17, %c2, %c0_18, %c0_19] : memref<1x3x8x128xf32, #tpu.memory_space<vmem>>, vector<1x1x8x128xf32>
    %34 = vector.shape_cast %33 : vector<1x1x8x128xf32> to vector<8x128xf32>
    %35 = vector.shape_cast %26 : vector<8x128xf32> to vector<1x1x8x128xf32>
    tpu.vector_store %arg3[%c0_17, %c2, %c0_18, %c0_19], %35 {strides = array<i32>} : memref<1x3x8x128xf32, #tpu.memory_space<vmem>>, vector<1x1x8x128xf32>,
    return
  }
  func.func @transform_0(%arg0: i32) -> (i32, i32) {
    %c0_i32 = arith.constant 0 : i32
    %c0_i32_0 = arith.constant 0 : i32
    return %arg0, %c0_i32 : i32, i32
  }
  func.func @transform_1(%arg0: i32) -> (i32, i32) {
    %c0_i32 = arith.constant 0 : i32
    %c0_i32_0 = arith.constant 0 : i32
    return %arg0, %c0_i32 : i32, i32
  }
  func.func @transform_2(%arg0: i32) -> (i32, i32, i32, i32) {
    %c0_i32 = arith.constant 0 : i32
    %c0_i32_0 = arith.constant 0 : i32
    %c0_i32_1 = arith.constant 0 : i32
    %c0_i32_2 = arith.constant 0 : i32
    return %arg0, %c0_i32, %c0_i32_0, %c0_i32_1 : i32, i32, i32, i32
  }
}

</mosaic_0001>

<bundles_post_ra>
// kernel: tpu_custom_call.1
= control target key start
LH: loop header
LB: loop body
LE: loop exit
PB: predicated region body
PF: predicated region fallthrough
CT: control target
= control target key end

     0   :  { %7 = vsyncpa [#allocation3], 0  ;;  %s239_s0 = inlined_call_operand.hbm [shape: f32[16,128], index: 0, kind: input, shape index: {}]   ;;  %s240_s1 = inlined_call_operand.hbm [shape: f32[16,128], index: 1, kind: input, shape index: {}]   ;;  %s241_s2 = inlined_call_operand.hbm [shape: f32[1,3,8,128], index: 2, kind: output, shape index: {}]  }
   0x1   :  { %8 = vsyncpa [#allocation6], 0 }
   0x2   :  { %9 = vsyncpa [#allocation4], 0  ;;  %s201_s9 = smov [#allocation2]  }
   0x3   :  { %s15_s10 = sshll.u32 %s201_s9, 4  ;;  %s16_s10 = int_to_ptr.vmem [resolvable:$true] %s15_s10 }
   0x4   :  { %s143_s11 = scalar_lea.vmem %s16_s10, 256  ;;  %p148_p1 = scmp.lt.s32.totalorder %s16_s10, %s16_s10 }
   0x5   :  { %p144_p0 = scmp.ne.s32.totalorder %s16_s10, %s143_s11  ;;  %p149_p2 = scmp.lt.s32.totalorder %s143_s11, %s143_s11 }
   0x7   :  { %p150_p3 = por %p149_p2, %p148_p1 }
   0x9   :  { %p151_p4 = pnand %p150_p3, %p144_p0 }
   0xb   :  { %154 = shalt.err (!%p151_p4)
}
   0xc   :  { %s202_s12 = smov 128   ;;  %s203_s13 = smov 8  }
   0xd   :  { %21 = dma.hbm_to_vmem [thread:$0]  %s239_s0, 256, %s16_s10, [#allocation3], %s202_s12, %s202_s12, %s203_s13  }
   0xe   :  { %s204_s16 = smov [#allocation5]  }
   0xf   :  { %s27_s17 = sshll.u32 %s204_s16, 4  ;;  %s28_s17 = int_to_ptr.vmem [resolvable:$true] %s27_s17 }
  0x10   :  { %s163_s18 = scalar_lea.vmem %s28_s17, 256  ;;  %p168_p6 = scmp.lt.s32.totalorder %s28_s17, %s28_s17 }
  0x11   :  { %p164_p5 = scmp.ne.s32.totalorder %s28_s17, %s163_s18  ;;  %p169_p7 = scmp.lt.s32.totalorder %s163_s18, %s163_s18 }
  0x13   :  { %p170_p8 = por %p169_p7, %p168_p6 }
  0x15   :  { %p171_p9 = pnand %p170_p8, %p164_p5 }
  0x17   :  { %174 = shalt.err (!%p171_p9)
}
  0x18   :  { %33 = dma.hbm_to_vmem [thread:$0]  %s240_s1, 256, %s28_s17, [#allocation6], %s202_s12, %s202_s12, %s203_s13  }
  0x19   :  { %195 = dma.done.wait [#allocation3], 256  }
  0x1a   :  { %196 = vsyncadd [#allocation3], 4294967040 }
  0x1b   :  { %197 = dma.done.wait [#allocation6], 256  }
  0x1c   :  { %198 = vsyncadd [#allocation6], 4294967040  ;;  %v40_v0 = vld [vmem:[#allocation2] sm:$0xff]  ;;  %v41_v1 = vld [vmem:[#allocation2 + $0x8] sm:$0xff]  ;;  %s205_s0 = smov [#allocation7]  }
  0x1d   :  { %v44_v2 = vand.u32 2147483647, %v40_v0  ;;  %v45_v3 = vand.u32 2147483647, %v41_v1  ;;  %v42_v13 = vld [vmem:[#allocation5] sm:$0xff]  ;;  %v43_v15 = vld [vmem:[#allocation5 + $0x8] sm:$0xff] }
  0x1e   :  { %vm52_vm0 = vcmp.ge.f32.partialorder %v40_v0, 0.0  ;;  %vm53_vm1 = vcmp.ge.f32.partialorder %v41_v1, 0.0  ;;  %v62_v16 = vmax.f32 %v40_v0, 0.0  ;;  %v63_v17 = vmax.f32 %v41_v1, 0.0  ;;  %s105_s1 = sshll.u32 %s205_s0, 4  ;;  %s106_s1 = int_to_ptr.vmem [resolvable:$true] %s105_s1 }
  0x1f   :  { %v46_v4 = vsub.f32 0.0, %v44_v2  ;;  %v47_v5 = vsub.f32 0.0, %v45_v3  ;;  %v64_v18 = vmul.f32 %v42_v13, %v40_v0  ;;  %v65_v21 = vmul.f32 %v43_v15, %v41_v1  ;;  %s175_s21 = scalar_lea.vmem %s106_s1, 384  ;;  %p180_p11 = scmp.lt.s32.totalorder %s106_s1, %s106_s1 }
  0x20   :  { %p176_p10 = scmp.ne.s32.totalorder %s106_s1, %s175_s21  ;;  %p181_p12 = scmp.lt.s32.totalorder %s175_s21, %s175_s21 }
  0x21   :  { %v48_v6 = vmul.f32 1.442695, %v46_v4  ;;  %v50_v7 = vmul.f32 1.442695, %v47_v5  ;;  %v66_v29 = vsub.f32 %v62_v16, %v64_v18  ;;  %v67_v33 = vsub.f32 %v63_v17, %v65_v21 }
  0x22   :  { %p182_p13 = por %p181_p12, %p180_p11 }
  0x23   :  { %123 = vpow2.f32 %v48_v6 }
  0x24   :  { %125 = vpow2.f32 %v50_v7  ;;  %p183_p0 = pnand %p182_p13, %p176_p10 }
  0x30   :  { %v124_v8 = vpop.eup %123 }
  0x31   :  { %v126_v9 = vpop.eup %125  ;;  %v56_v10 = vadd.f32 1.0, %v124_v8  ;;  %v71_v12 = vmul.f32 -0.5, %v124_v8  ;;  %v54_v20 = vsel %vm52_vm0, 1.0, %v124_v8  ;;  %v74_v22 = vand.u32 2147483647, %v124_v8 }
  0x32   :  { %v57_v11 = vadd.f32 1.0, %v126_v9  ;;  %v80_v14 = vmul.f32 -0.5, %v126_v9  ;;  %v55_v24 = vsel %vm53_vm1, 1.0, %v126_v9  ;;  %v83_v25 = vand.u32 2147483647, %v126_v9 }
  0x33   :  { %127 = vrcp.f32 %v56_v10  ;;  %v72_v19 = vadd.f32 1.0, %v71_v12  ;;  %vm75_vm2 = vcmp.lt.f32.partialorder %v74_v22, 0.0004427343 }
  0x34   :  { %129 = vrcp.f32 %v57_v11  ;;  %v81_v23 = vadd.f32 1.0, %v80_v14  ;;  %vm84_vm3 = vcmp.lt.f32.partialorder %v83_v25, 0.0004427343 }
  0x35   :  { %131 = vlog2.f32 %v56_v10  ;;  %v73_v30 = vmul.f32 %v124_v8, %v72_v19 }
  0x36   :  { %133 = vlog2.f32 %v57_v11  ;;  %v82_v34 = vmul.f32 %v126_v9, %v81_v23 }
  0x40   :  { %v128_v26 = vpop.eup %127 }
  0x41   :  { %v130_v27 = vpop.eup %129  ;;  %v59_v28 = vmul.f32 %v128_v26, %v54_v20 }
  0x42   :  { %v132_v31 = vpop.eup %131  ;;  %v61_v32 = vmul.f32 %v130_v27, %v55_v24 }
  0x43   :  { %v134_v35 = vpop.eup %133  ;;  %v88_v36 = vmul.f32 %v59_v28, %v42_v13  ;;  %v91_v37 = vadd.f32 %v59_v28, %v42_v13  ;;  %v70_v38 = vmul.f32 0.6931472, %v132_v31 }
  0x44   :  { %v89_v39 = vmul.f32 %v61_v32, %v43_v15  ;;  %v92_v40 = vadd.f32 %v61_v32, %v43_v15  ;;  %v79_v41 = vmul.f32 0.6931472, %v134_v35 }
  0x45   :  { %v76_v42 = vsel %vm75_vm2, %v73_v30, %v70_v38 }
  0x46   :  { %v90_v43 = vadd.f32 %v89_v39, %v88_v36  ;;  %v93_v44 = vadd.f32 %v92_v40, %v91_v37  ;;  %v85_v45 = vsel %vm84_vm3, %v82_v34, %v79_v41  ;;  %v86_v46 = vadd.f32 %v76_v42, %v66_v29 }
  0x47   :  { %v87_v47 = vadd.f32 %v85_v45, %v67_v33 }
  0x48   :  { %95 = vst [vmem:[#allocation7] sm:$0xff] %v90_v43  ;;  %97 = vst [vmem:[#allocation7 + $0x8] sm:$0xff] %v93_v44 }
  0x49   :  { %v94_v48 = vadd.f32 %v87_v47, %v86_v46 }
  0x4b   :  { %99 = vst [vmem:[#allocation7 + $0x10] sm:$0xff] %v94_v48 }
  0x4c   :  { %186 = shalt.err (!%p183_p0)
}
  0x4d   :  { %111 = dma.vmem_to_hbm [thread:$0]  %s106_s1, 384, %s241_s2, [#allocation4], %s202_s12, %s202_s12, %s203_s13  }
  0x4e   :  { %199 = dma.done.wait [#allocation4], 384  }
  0x4f   :  { %200 = vsyncadd [#allocation4], 4294966912 }
  0x50   :  { %115 = vsyncpa [#allocation3], 1 }
  0x51   :  { %116 = vsyncpa [#allocation6], 1 }
  0x52   :  { %117 = vsyncpa [#allocation4], 1 }

</bundles_post_ra>
